<compile_context>
chip_gen: v6e
topology: v6e:2x2x1
jax: 0.10.0
libtpu: 0.0.40
codegen_flags: <defaults>
</compile_context>

<pallas_src>
import functools
import math

import jax
import jax.numpy as jnp
from jax.experimental import pallas as pl
from jax.experimental.pallas import tpu as pltpu

BN_EPS = 1e-5


# ----------------------------------------------------------------------------
# Kernel
# ----------------------------------------------------------------------------
def _selfpooling_kernel(pv_ref, pb_ref, w_ref, b_ref, out_ref, *, softmax_bf16):
    # pv_ref : (TB, L, D)    probe_value tile
    # pb_ref : (TB, L, Cin)  probe_base tile
    # w_ref  : (Cin, D)      BN-folded, pre-transposed Linear weight (bf16)
    # b_ref  : (1, D)        BN-folded bias (f32)
    # out_ref: (TB, D)
    tb, seq_len, cin = pb_ref.shape
    d = w_ref.shape[1]

    # Linear (+ folded BN): all TB*L rows in a single MXU matmul, bf16 inputs,
    # f32 accumulation.
    x = pb_ref[...].reshape(tb * seq_len, cin).astype(jnp.bfloat16)
    q = jnp.dot(x, w_ref[...], preferred_element_type=jnp.float32)    # (TB*L, D)
    q = (q + b_ref[...]).reshape(tb, seq_len, d)                      # (TB, L, D)

    # Qmean over the sequence dim; logits = Hs * tmp_K.
    qmean = jnp.sum(q, axis=1, keepdims=True) * (1.0 / seq_len)       # (TB, 1, D)
    logits = qmean * q                                                # (TB, L, D)

    # Softmax over the sequence dim (per output feature) -- equivalent to the
    # permute/view/softmax(dim=-1)/view/permute in the PyTorch code.
    m = jnp.max(logits, axis=1, keepdims=True)
    shifted = logits - m
    if softmax_bf16:
        # Large tiles (v6e/v7x bf16 VALUs): bf16 intermediates halve vreg
        # pressure; denominator and pooled accumulation stay in f32.
        e = jnp.exp(shifted).astype(jnp.bfloat16)                     # (TB, L, D)
        denom = jnp.sum(e.astype(jnp.float32), axis=1, keepdims=True)  # (TB, 1, D)
        inv = pl.reciprocal(denom, approx=True).astype(jnp.bfloat16)
        prod = pv_ref[...].astype(jnp.bfloat16) * (e * inv)           # (TB, L, D)
        pooled = jnp.sum(prod.astype(jnp.float32), axis=1)            # (TB, D)
    else:
        e = jnp.exp(shifted)
        denom = jnp.sum(e, axis=1, keepdims=True)
        attn = e * pl.reciprocal(denom, approx=True)                  # (TB, L, D)
        pooled = jnp.sum(pv_ref[...].astype(jnp.float32) * attn, axis=1)

    out_ref[...] = pooled.astype(out_ref.dtype)


# ----------------------------------------------------------------------------
# Block-size selection (padded-size aware, generation-aware VMEM budget)
# ----------------------------------------------------------------------------
def _cdiv(a, b):
    return -(-a // b)


def _round_up(a, b):
    return _cdiv(a, b) * b


def _padded_tile_bytes(shape, itemsize):
    """VMEM footprint of one block: last dim pads to 128 lanes; second-to-last
    pads to the sublane multiple for the dtype (8 for 4B, 16 for 2B, 32 for 1B)."""
    dims = list(shape)
    dims[-1] = _round_up(dims[-1], 128)
    if len(dims) >= 2:
        dims[-2] = _round_up(dims[-2], 8 * (4 // itemsize))
    n = itemsize
    for d in dims:
        n *= d
    return n


def _vmem_capacity_bytes():
    """Physical VMEM per TensorCore: v5e/v6e ~128 MiB, v7x 64 MiB. Fall back to
    the conservative 64 MiB if the query is unavailable."""
    default = 64 * 1024 * 1024
    try:
        info = pltpu.get_tpu_info()
        return int(getattr(info, "vmem_capacity_bytes", default))
    except Exception:  # pragma: no cover - no TPU info available
        return default


def _pick_block_b(B, L, D, Cin, pv_itemsize, pb_itemsize, block_budget_bytes,
                  *, target_rows=2048):
    """Pick (block_b, grid_steps).

    Multi-step tiles are multiples of 8 batch rows (sublane-aligned 2-D output
    block => dense unmasked stores); a single-step tile equals the full batch
    (block == array dims). The tile grows until it hits the row target or the
    padded, double-buffered VMEM budget. The kernel is HBM/per-step-overhead
    bound, so bigger tiles are better until VMEM runs out.
    """

    def fits(tb):
        blk = 2 * (_padded_tile_bytes((tb, L, D), pv_itemsize)      # probe_value
                   + _padded_tile_bytes((tb, L, Cin), pb_itemsize)  # probe_base
                   + _padded_tile_bytes((tb, D), 4))                # output
        return blk <= block_budget_bytes

    row_cap = max(target_rows, 8 * L)
    tb_hi = max(8, min(_round_up(B, 8), _round_up(max(target_rows // L, 1), 8)))

    tb = 8
    for cand in range(8, tb_hi + 1, 8):
        if cand * L <= row_cap and fits(cand):
            tb = cand
    steps = _cdiv(B, tb)

    if steps == 1:
        if B >= 16:
            # Batch is big enough to split: >=2 steps enables DMA/compute
            # pipelining and keeps both v7x TensorCores busy.
            steps = 2
            tb = _round_up(_cdiv(B, steps), 8)
        else:
            tb = B  # tiny batch: single full-array block, no padding at all
    else:
        # Same step count, smallest aligned tile that still covers B.
        tb = min(tb, _round_up(_cdiv(B, steps), 8))
        # v7x megacore: round an odd step count up to even when it costs no
        # extra padded work.
        if steps % 2 == 1:
            alt_steps = steps + 1
            alt_tb = _round_up(_cdiv(B, alt_steps), 8)
            if alt_steps * alt_tb <= steps * tb:
                steps, tb = alt_steps, alt_tb
        steps = _cdiv(B, tb)

    return tb, steps


# ----------------------------------------------------------------------------
# Host-side parameter folding & wrapper
# ----------------------------------------------------------------------------
def fold_bn_params(params):
    """Fold eval-mode BatchNorm1d + Linear bias into (W_t, b) on the host.

    Returns W_t with shape (Cin, D) (lane-dense, natural MXU orientation, bf16)
    and b with shape (1, D) (f32).
    """
    scale = params["gamma"] * jax.lax.rsqrt(params["running_var"] + BN_EPS)   # (1, D)
    w_t = (params["W"].T * scale).astype(jnp.bfloat16)                        # (Cin, D)
    b = (params["bias"] - params["running_mean"]) * scale + params["beta"]    # (1, D)
    return w_t, b.astype(jnp.float32)


def self_pooling_dir(probe_value, probe_base, params, *, block_b=None,
                     softmax_bf16=None):
    """Pallas forward for SelfPoolingDir. Returns (pool_probe, pool_probe)."""
    B, L, D = probe_value.shape
    Bb, Lb, Cin = probe_base.shape
    assert (Bb, Lb) == (B, L)

    w_t, b_fold = fold_bn_params(params)

    pv_isize = jnp.dtype(probe_value.dtype).itemsize
    pb_isize = jnp.dtype(probe_base.dtype).itemsize

    # Generation-aware VMEM budget: request 3/4 of physical VMEM as the scoped
    # limit, reserve the (double-buffered, padded) weight/bias blocks plus 20%
    # headroom for compiler scratch, and let the rest drive the tile size.
    vmem_cap = _vmem_capacity_bytes()
    vmem_limit = (vmem_cap * 3) // 4
    const_bytes = 2 * (_padded_tile_bytes((Cin, D), w_t.dtype.itemsize)
                       + _padded_tile_bytes((1, D), 4))
    block_budget = max(int((vmem_limit - const_bytes) * 0.8), 4 * 1024 * 1024)

    if block_b is None:
        block_b, steps = _pick_block_b(B, L, D, Cin, pv_isize, pb_isize,
                                       block_budget)
    else:
        steps = _cdiv(B, block_b)
    B_pad = steps * block_b

    if B_pad != B:
        # Pad the batch instead of degrading to tiny blocks for awkward B.
        pad = ((0, B_pad - B), (0, 0), (0, 0))
        probe_value = jnp.pad(probe_value, pad)
        probe_base = jnp.pad(probe_base, pad)

    if softmax_bf16 is None:
        # Only worth it at large tiles (vreg pressure); v6e/v7x have bf16
        # VALUs. Pass softmax_bf16=False explicitly on v5e if desired.
        softmax_bf16 = block_b * L >= 256

    cost = pl.CostEstimate(
        flops=2 * B_pad * L * Cin * D + 8 * B_pad * L * D,
        transcendentals=B_pad * L * D,
        bytes_accessed=(B_pad * L * D * pv_isize
                        + B_pad * L * Cin * pb_isize
                        + Cin * D * w_t.dtype.itemsize
                        + D * 4
                        + B_pad * D * pv_isize),
    )

    kernel = functools.partial(_selfpooling_kernel, softmax_bf16=softmax_bf16)

    out = pl.pallas_call(
        kernel,
        out_shape=jax.ShapeDtypeStruct((B_pad, D), probe_value.dtype),
        grid=(steps,),
        in_specs=[
            pl.BlockSpec((block_b, L, D), lambda b: (b, 0, 0)),    # probe_value
            pl.BlockSpec((block_b, L, Cin), lambda b: (b, 0, 0)),  # probe_base
            pl.BlockSpec((Cin, D), lambda b: (0, 0)),              # folded W^T
            pl.BlockSpec((1, D), lambda b: (0, 0)),                # folded bias
        ],
        out_specs=pl.BlockSpec((block_b, D), lambda b: (b, 0)),
        compiler_params=pltpu.CompilerParams(
            dimension_semantics=("parallel",),
            vmem_limit_bytes=int(vmem_limit)),
        cost_estimate=cost,
    )(probe_value, probe_base, w_t, b_fold)

    pooled = out[:B]
    return pooled, pooled


# ----------------------------------------------------------------------------
# Pure-JAX reference & deterministic init
# ----------------------------------------------------------------------------
def _reference(probe_value, probe_base, params):
    """Pure-JAX reference mirroring the PyTorch forward (eval-mode BN)."""
    B, L, D = probe_value.shape
    x = probe_base.reshape(B * L, -1)
    q = jnp.dot(x, params["W"].T, precision=jax.lax.Precision.HIGHEST) + params["bias"]
    q = (q - params["running_mean"]) / jnp.sqrt(params["running_var"] + BN_EPS) \
        * params["gamma"] + params["beta"]
    q = q.reshape(B, L, D)
    qmean = jnp.mean(q, axis=1, keepdims=True)
    w = jax.nn.softmax(qmean * q, axis=1)   # softmax over the sequence dim
    return jnp.sum(probe_value * w, axis=1)


def init_params(key, input_num, output_num):
    # Deterministic synthetic init mirroring the module's __init__ shapes:
    # kaiming_uniform_(mode='fan_out') for Linear weight, zeros for bias,
    # ones/zeros for BN affine, default running stats.
    bound = math.sqrt(2.0) * math.sqrt(3.0 / output_num)
    W = jax.random.uniform(key, (output_num, input_num), jnp.float32,
                           minval=-bound, maxval=bound)
    return {
        "W": W,
        "bias": jnp.zeros((1, output_num), jnp.float32),
        "gamma": jnp.ones((1, output_num), jnp.float32),
        "beta": jnp.zeros((1, output_num), jnp.float32),
        "running_mean": jnp.zeros((1, output_num), jnp.float32),
        "running_var": jnp.ones((1, output_num), jnp.float32),
    }


if __name__ == "__main__":
    input_num, output_num = 32, 128
    key = jax.random.PRNGKey(0)
    k_pv, k_pb, k_w, k_pv2, k_pb2 = jax.random.split(key, 5)
    params = init_params(k_w, input_num, output_num)

    # Canonical small shape (single full-array block, grid of 1).
    B, L = 2, 8
    probe_value = jax.random.normal(k_pv, (B, L, output_num), jnp.float32)
    probe_base = jax.random.normal(k_pb, (B, L, input_num), jnp.float32)

    pool_probe, pool_probe2 = self_pooling_dir(probe_value, probe_base, params)
    jax.block_until_ready(pool_probe)

    ref = _reference(probe_value, probe_base, params)
    assert pool_probe.shape == (B, output_num)
    # Kernel runs the matmul on the bf16 MXU path and uses an approx EUP
    # reciprocal for the softmax denominator, so compare with a looser
    # tolerance than the f32-HIGHEST reference.
    assert jnp.allclose(pool_probe, ref, rtol=1e-2, atol=1e-2), \
        f"max abs err {jnp.max(jnp.abs(pool_probe - ref))}"
    assert jnp.array_equal(pool_probe, pool_probe2)

    # Awkward batch size: exercises the padded, sublane-aligned multi-step path
    # (block_b multiple of 8, grid >= 2, dense 2-D output stores).
    B2 = 20
    pv2 = jax.random.normal(k_pv2, (B2, L, output_num), jnp.float32)
    pb2 = jax.random.normal(k_pb2, (B2, L, input_num), jnp.float32)
    out2, _ = self_pooling_dir(pv2, pb2, params)
    jax.block_until_ready(out2)
    ref2 = _reference(pv2, pb2, params)
    assert out2.shape == (B2, output_num)
    assert jnp.allclose(out2, ref2, rtol=1e-2, atol=1e-2), \
        f"max abs err {jnp.max(jnp.abs(out2 - ref2))}"

    print("KERNEL_OK")
</pallas_src>

<mosaic_0001>
module attributes {stable_mosaic.version = 11 : i64} {
  func.func @_selfpooling_kernel(%arg0: i32, %arg1: memref<2x8x128xf32, #tpu.memory_space<vmem>>, %arg2: memref<2x8x32xf32, #tpu.memory_space<vmem>>, %arg3: memref<32x128xbf16, #tpu.memory_space<vmem>>, %arg4: memref<1x128xf32, #tpu.memory_space<vmem>>, %arg5: memref<2x128xf32, #tpu.memory_space<vmem>>) attributes {dimension_semantics = [#tpu.dimension_semantics<parallel>], iteration_bounds = array<i64: 1>, scalar_prefetch = 0 : i64, scratch_operands = 0 : i64, tpu.core_type = #tpu.core_type<tc>, window_params = [{transform_indices = @transform_0, window_bounds = array<i64: 2, 8, 128>}, {transform_indices = @transform_1, window_bounds = array<i64: 2, 8, 32>}, {pipeline_mode = #tpu.pipeline_mode<synchronous>, transform_indices = @transform_2, window_bounds = array<i64: 32, 128>}, {pipeline_mode = #tpu.pipeline_mode<synchronous>, transform_indices = @transform_3, window_bounds = array<i64: 1, 128>}, {transform_indices = @transform_4, window_bounds = array<i64: 2, 128>}]} {
    %c0 = arith.constant 0 : index
    %c0_0 = arith.constant 0 : index
    %c0_1 = arith.constant 0 : index
    %0 = vector.load %arg2[%c0, %c0_0, %c0_1] : memref<2x8x32xf32, #tpu.memory_space<vmem>>, vector<2x8x32xf32>
    %1 = vector.shape_cast %0 : vector<2x8x32xf32> to vector<16x32xf32>
    %2 = arith.truncf %1 : vector<16x32xf32> to vector<16x32xbf16>
    %c0_2 = arith.constant 0 : index
    %c0_3 = arith.constant 0 : index
    %3 = vector.load %arg3[%c0_2, %c0_3] : memref<32x128xbf16, #tpu.memory_space<vmem>>, vector<32x128xbf16>
    %cst = arith.constant dense<0.000000e+00> : vector<16x128xf32>
    %4 = tpu.matmul %2, %3, %cst {dimension_numbers = #tpu.dot_dimension_numbers<[1], [0], [0], [1], [0, 0, 1, 1], [], []>} : vector<16x32xbf16>, vector<32x128xbf16>, vector<16x128xf32> -> vector<16x128xf32>
    %c0_4 = arith.constant 0 : index
    %c0_5 = arith.constant 0 : index
    %5 = vector.load %arg4[%c0_4, %c0_5] : memref<1x128xf32, #tpu.memory_space<vmem>>, vector<1x128xf32>
    %6 = vector.broadcast %5 : vector<1x128xf32> to vector<16x128xf32>
    %7 = arith.addf %4, %6 : vector<16x128xf32>
    %8 = vector.shape_cast %7 : vector<16x128xf32> to vector<2x8x128xf32>
    %cst_6 = arith.constant dense<0.000000e+00> : vector<2x128xf32>
    %9 = vector.multi_reduction <add>, %8, %cst_6 [1] : vector<2x8x128xf32> to vector<2x128xf32>
    %10 = vector.shape_cast %9 : vector<2x128xf32> to vector<2x1x128xf32>
    %cst_7 = arith.constant 1.250000e-01 : f32
    %11 = vector.broadcast %cst_7 : f32 to vector<2x1x128xf32>
    %12 = arith.mulf %10, %11 : vector<2x1x128xf32>
    %13 = vector.broadcast %12 : vector<2x1x128xf32> to vector<2x8x128xf32>
    %14 = arith.mulf %13, %8 : vector<2x8x128xf32>
    %cst_8 = arith.constant dense<0xFF800000> : vector<2x128xf32>
    %15 = vector.multi_reduction <maximumf>, %14, %cst_8 [1] : vector<2x8x128xf32> to vector<2x128xf32>
    %16 = vector.shape_cast %15 : vector<2x128xf32> to vector<2x1x128xf32>
    %17 = vector.broadcast %16 : vector<2x1x128xf32> to vector<2x8x128xf32>
    %18 = arith.subf %14, %17 : vector<2x8x128xf32>
    %19 = math.exp %18 : vector<2x8x128xf32>
    %cst_9 = arith.constant dense<0.000000e+00> : vector<2x128xf32>
    %20 = vector.multi_reduction <add>, %19, %cst_9 [1] : vector<2x8x128xf32> to vector<2x128xf32>
    %21 = vector.shape_cast %20 : vector<2x128xf32> to vector<2x1x128xf32>
    %22 = tpu.reciprocal %21 {approx = true} : vector<2x1x128xf32> -> vector<2x1x128xf32>
    %23 = vector.broadcast %22 : vector<2x1x128xf32> to vector<2x8x128xf32>
    %24 = arith.mulf %19, %23 : vector<2x8x128xf32>
    %c0_10 = arith.constant 0 : index
    %c0_11 = arith.constant 0 : index
    %c0_12 = arith.constant 0 : index
    %25 = vector.load %arg1[%c0_10, %c0_11, %c0_12] : memref<2x8x128xf32, #tpu.memory_space<vmem>>, vector<2x8x128xf32>
    %26 = arith.mulf %25, %24 : vector<2x8x128xf32>
    %cst_13 = arith.constant dense<0.000000e+00> : vector<2x128xf32>
    %27 = vector.multi_reduction <add>, %26, %cst_13 [1] : vector<2x8x128xf32> to vector<2x128xf32>
    %c0_14 = arith.constant 0 : index
    %c0_15 = arith.constant 0 : index
    %28 = vector.load %arg5[%c0_14, %c0_15] : memref<2x128xf32, #tpu.memory_space<vmem>>, vector<2x128xf32>
    tpu.vector_store %arg5[%c0_14, %c0_15], %27 {strides = array<i32>} : memref<2x128xf32, #tpu.memory_space<vmem>>, vector<2x128xf32>,
    return
  }
  func.func @transform_0(%arg0: i32) -> (i32, i32, i32) {
    %c0_i32 = arith.constant 0 : i32
    %c0_i32_0 = arith.constant 0 : i32
    %c0_i32_1 = arith.constant 0 : i32
    return %arg0, %c0_i32, %c0_i32_0 : i32, i32, i32
  }
  func.func @transform_1(%arg0: i32) -> (i32, i32, i32) {
    %c0_i32 = arith.constant 0 : i32
    %c0_i32_0 = arith.constant 0 : i32
    %c0_i32_1 = arith.constant 0 : i32
    return %arg0, %c0_i32, %c0_i32_0 : i32, i32, i32
  }
  func.func @transform_2(%arg0: i32) -> (i32, i32) {
    %c0_i32 = arith.constant 0 : i32
    %c0_i32_0 = arith.constant 0 : i32
    %c0_i32_1 = arith.constant 0 : i32
    return %c0_i32, %c0_i32_0 : i32, i32
  }
  func.func @transform_3(%arg0: i32) -> (i32, i32) {
    %c0_i32 = arith.constant 0 : i32
    %c0_i32_0 = arith.constant 0 : i32
    %c0_i32_1 = arith.constant 0 : i32
    return %c0_i32, %c0_i32_0 : i32, i32
  }
  func.func @transform_4(%arg0: i32) -> (i32, i32) {
    %c0_i32 = arith.constant 0 : i32
    %c0_i32_0 = arith.constant 0 : i32
    return %arg0, %c0_i32 : i32, i32
  }
}

</mosaic_0001>

<bundles_post_ra>
// kernel: tpu_custom_call.1
= control target key start
LH: loop header
LB: loop body
LE: loop exit
PB: predicated region body
PF: predicated region fallthrough
CT: control target
= control target key end

     0   :  { %9 = vsyncpa [#allocation3], 0  ;;  %s390_s0 = inlined_call_operand.hbm [shape: f32[2,8,128], index: 0, kind: input, shape index: {}]   ;;  %s391_s1 = inlined_call_operand.hbm [shape: f32[2,8,32], index: 1, kind: input, shape index: {}]   ;;  %s392_s2 = inlined_call_operand.hbm [shape: bf16[32,128], index: 2, kind: input, shape index: {}]   ;;  %s393_s3 = inlined_call_operand.vmem [shape: f32[1,128], index: 3, kind: input, shape index: {}]   ;;  %s394_s4 = inlined_call_operand.hbm [shape: f32[2,128], index: 4, kind: output, shape index: {}]  }
   0x1   :  { %10 = vsyncpa [#allocation6], 0 }
   0x2   :  { %11 = vsyncpa [#allocation4], 0  ;;  %s340_s15 = smov [#allocation5]   ;;  %s341_s17 = smov [#allocation2]  }
   0x3   :  { %s29_s16 = sshll.u32 %s340_s15, 4  ;;  %s17_s18 = sshll.u32 %s341_s17, 4  ;;  %s30_s16 = int_to_ptr.vmem [resolvable:$true] %s29_s16  ;;  %s18_s18 = int_to_ptr.vmem [resolvable:$true] %s17_s18 }
   0x4   :  { %s262_s19 = scalar_lea.vmem %s30_s16, 256  ;;  %p267_p1 = scmp.lt.s32.totalorder %s30_s16, %s30_s16 }
   0x5   :  { %p263_p0 = scmp.ne.s32.totalorder %s30_s16, %s262_s19  ;;  %p268_p2 = scmp.lt.s32.totalorder %s262_s19, %s262_s19 }
   0x7   :  { %p269_p3 = por %p268_p2, %p267_p1 }
   0x9   :  { %p270_p4 = pnand %p269_p3, %p263_p0 }
   0xb   :  { %273 = shalt.err (!%p270_p4)
}
   0xc   :  { %s342_s20 = smov 128   ;;  %s343_s21 = smov 8  }
   0xd   :  { %35 = dma.hbm_to_vmem [thread:$0]  %s391_s1, 256, %s30_s16, [#allocation6], %s342_s20, %s342_s20, %s343_s21  }
   0xe   :  { %s282_s24 = scalar_lea.vmem %s18_s18, 256  ;;  %p287_p6 = scmp.lt.s32.totalorder %s18_s18, %s18_s18 }
   0xf   :  { %p283_p5 = scmp.ne.s32.totalorder %s18_s18, %s282_s24  ;;  %p288_p7 = scmp.lt.s32.totalorder %s282_s24, %s282_s24 }
  0x11   :  { %p289_p8 = por %p288_p7, %p287_p6 }
  0x13   :  { %p290_p9 = pnand %p289_p8, %p283_p5 }
  0x15   :  { %293 = shalt.err (!%p290_p9)
}
  0x16   :  { %23 = dma.hbm_to_vmem [thread:$0]  %s390_s0, 256, %s18_s18, [#allocation3], %s342_s20, %s342_s20, %s343_s21  }
  0x17   :  { %s344_s27 = smov [#allocation7]  }
  0x18   :  { %s41_s28 = sshll.u32 %s344_s27, 4  ;;  %s42_s28 = int_to_ptr.vmem [resolvable:$true] %s41_s28 }
  0x19   :  { %s302_s29 = scalar_lea.vmem %s42_s28, 256  ;;  %p307_p11 = scmp.lt.s32.totalorder %s42_s28, %s42_s28 }
  0x1a   :  { %p303_p10 = scmp.ne.s32.totalorder %s42_s28, %s302_s29  ;;  %p308_p12 = scmp.lt.s32.totalorder %s302_s29, %s302_s29 }
  0x1c   :  { %p309_p13 = por %p308_p12, %p307_p11 }
  0x1e   :  { %p310_p0 = pnand %p309_p13, %p303_p10 }
  0x20   :  { %313 = shalt.err (!%p310_p0)
}
  0x21   :  { %s345_s1 = smov 64   ;;  %s346_s30 = smov 4  }
  0x22   :  { %47 = dma.hbm_to_vmem [thread:$0]  %s392_s2, 256, %s42_s28, [#allocation6], %s345_s1, %s345_s1, %s346_s30  }
  0x23   :  { %334 = dma.done.wait [#allocation3], 256  }
  0x24   :  { %335 = vsyncadd [#allocation3], 4294967040 }
  0x25   :  { %336 = dma.done.wait [#allocation6], 512  }
  0x26   :  { %337 = vsyncadd [#allocation6], 4294966784  ;;  %v347_v0 = vmov 0.0   ;;  %vm348_vm0 = vmmov 0   ;;  %v244_v1 = vld [vmem:[#allocation7 + $0x8] sm:$0xff]   ;;  %v245_v2 = vld [vmem:[#allocation7] sm:$0xff]  }
  0x27   :  { %226 = vmatprep.subr.bf16.mxu0 %v347_v0  ;;  %230 = vmatprep.mubr.msk.bf16.mxu0 %vm348_vm0, %v347_v0  ;;  %v60_v3 = vld [vmem:[#allocation5] sm:$0xff]  ;;  %v61_v4 = vld [vmem:[#allocation5 + $0x8] sm:$0xff]  ;;  %vm86_vm1 = vcmask 261120   ;;  %v219_v6 = vld [vmem:[%s393_s3] ss:$0 sm:$0xff]  ;;  %s349_s3 = smov [#allocation8]  }
  0x28   :  { %227 = vmatpush3.bf16.msra.mxu0 %v244_v1  ;;  %v62_v5 = vpack.c.bf16 %v61_v4, %v60_v3  ;;  %v181_v60 = vld [vmem:[#allocation2] sm:$0xff]  ;;  %s209_s7 = sshll.u32 %s349_s3, 4  ;;  %vm199_vm2 = vcmask 1041409   ;;  %s210_s7 = int_to_ptr.vmem [resolvable:$true] %s209_s7 }
  0x29   :  { %228 = vmatprep.subr.bf16.mxu0 %v347_v0  ;;  %v182_v0 = vld [vmem:[#allocation2 + $0x8] sm:$0xff]  ;;  %s314_s8 = scalar_lea.vmem %s210_s7, 32  ;;  %p319_p2 = scmp.lt.s32.totalorder %s210_s7, %s210_s7 }
  0x2a   :  { %p315_p1 = scmp.ne.s32.totalorder %s210_s7, %s314_s8  ;;  %p320_p3 = scmp.lt.s32.totalorder %s314_s8, %s314_s8 }
  0x2c   :  { %229 = vmatpush3.bf16.msra.mxu0 %v245_v2  ;;  %p321_p4 = por %p320_p3, %p319_p2 }
  0x2e   :  { %p322_p5 = pnand %p321_p4, %p315_p1 }
  0x2f   :  { %231 = vmatmul.mubr.msk.bf16.vlgmr.msra.gmra.mxu0 %vm86_vm1, %v62_v5 }
  0xef   :  { %v124_v7 = vpop.f32.mrf.mxu0 }
  0xf0   :  { %v125_v8 = vadd.f32 %v219_v6, %v124_v7 }
  0xf1   :  { %v232_v9 = vpop.f32.mrf.mxu0 }
  0xf2   :  { %v131_v10 = vrot.slane %v125_v8, 4 }
  0xf3   :  { %v127_v11 = vpop.f32.mrf.mxu0 }
  0xf4   :  { %v132_v12 = vadd.f32 %v131_v10, %v125_v8  ;;  %v128_v13 = vadd.f32 %v219_v6, %v127_v11 }
  0xf5   :  { %v233_v14 = vpop.f32.mrf.mxu0 }
  0xf6   :  { %v133_v15 = vrot.slane %v132_v12, 2  ;;  %v137_v16 = vrot.slane %v128_v13, 4 }
  0xf8   :  { %v134_v17 = vadd.f32 %v133_v15, %v132_v12  ;;  %v138_v18 = vadd.f32 %v137_v16, %v128_v13 }
  0xfa   :  { %v135_v19 = vrot.slane %v134_v17, 1  ;;  %v139_v20 = vrot.slane %v138_v18, 2 }
  0xfc   :  { %v136_v21 = vadd.f32 %v135_v19, %v134_v17  ;;  %v140_v22 = vadd.f32 %v139_v20, %v138_v18 }
  0xfe   :  { %v143_v23 = vmul.f32 0.125, %v136_v21  ;;  %v141_v24 = vrot.slane %v140_v22, 1 }
 0x100   :  { %v145_v25 = vmul.f32 %v143_v23, %v125_v8  ;;  %v142_v26 = vadd.f32 %v141_v24, %v140_v22 }
 0x102   :  { %v147_v27 = vrot.slane %v145_v25, 4  ;;  %v144_v28 = vmul.f32 0.125, %v142_v26 }
 0x104   :  { %v148_v29 = vmax.f32 %v145_v25, %v147_v27  ;;  %v146_v30 = vmul.f32 %v144_v28, %v128_v13 }
 0x106   :  { %v149_v31 = vrot.slane %v148_v29, 2  ;;  %v153_v32 = vrot.slane %v146_v30, 4 }
 0x108   :  { %v150_v33 = vmax.f32 %v148_v29, %v149_v31  ;;  %v154_v34 = vmax.f32 %v146_v30, %v153_v32 }
 0x10a   :  { %v151_v35 = vrot.slane %v150_v33, 1  ;;  %v155_v36 = vrot.slane %v154_v34, 2 }
 0x10c   :  { %v152_v37 = vmax.f32 %v150_v33, %v151_v35  ;;  %v156_v38 = vmax.f32 %v154_v34, %v155_v36 }
 0x10e   :  { %v159_v39 = vsub.f32 %v145_v25, %v152_v37  ;;  %v157_v40 = vrot.slane %v156_v38, 1 }
 0x110   :  { %v161_v41 = vmul.f32 1.442695, %v159_v39  ;;  %v158_v42 = vmax.f32 %v156_v38, %v157_v40 }
 0x112   :  { %246 = vpow2.f32 %v161_v41  ;;  %v160_v43 = vsub.f32 %v146_v30, %v158_v42 }
 0x114   :  { %v163_v44 = vmul.f32 1.442695, %v160_v43 }
 0x116   :  { %248 = vpow2.f32 %v163_v44 }
 0x11f   :  { %v247_v45 = vpop.eup %246 }
 0x120   :  { %v165_v46 = vrot.slane %v247_v45, 4 }
 0x122   :  { %v166_v47 = vadd.f32 %v247_v45, %v165_v46 }
 0x123   :  { %v249_v48 = vpop.eup %248 }
 0x124   :  { %v167_v49 = vrot.slane %v166_v47, 2  ;;  %v171_v50 = vrot.slane %v249_v48, 4 }
 0x126   :  { %v168_v51 = vadd.f32 %v167_v49, %v166_v47  ;;  %v172_v52 = vadd.f32 %v249_v48, %v171_v50 }
 0x128   :  { %v169_v53 = vrot.slane %v168_v51, 1  ;;  %v173_v54 = vrot.slane %v172_v52, 2 }
 0x12a   :  { %v170_v55 = vadd.f32 %v169_v53, %v168_v51  ;;  %v174_v56 = vadd.f32 %v173_v54, %v172_v52 }
 0x12c   :  { %v175_v57 = vrot.slane %v174_v56, 1  ;;  %250 = vrcp.f32 %v170_v55 }
 0x12e   :  { %v176_v58 = vadd.f32 %v175_v57, %v174_v56 }
 0x130   :  { %252 = vrcp.f32 %v176_v58 }
 0x139   :  { %v251_v59 = vpop.eup %250 }
 0x13a   :  { %v179_v61 = vmul.f32 %v251_v59, %v247_v45 }
 0x13c   :  { %v183_v62 = vmul.f32 %v181_v60, %v179_v61 }
 0x13d   :  { %v253_v63 = vpop.eup %252 }
 0x13e   :  { %v180_v1 = vmul.f32 %v253_v63, %v249_v48  ;;  %v185_v2 = vrot.slane %v183_v62, 4 }
 0x140   :  { %v184_v3 = vmul.f32 %v182_v0, %v180_v1  ;;  %v186_v4 = vadd.f32 %v185_v2, %v183_v62 }
 0x142   :  { %v187_v5 = vrot.slane %v186_v4, 2  ;;  %v191_v6 = vrot.slane %v184_v3, 4 }
 0x144   :  { %v188_v7 = vadd.f32 %v187_v5, %v186_v4  ;;  %v192_v8 = vadd.f32 %v191_v6, %v184_v3 }
 0x146   :  { %v193_v9 = vrot.slane %v192_v8, 2  ;;  %v189_v10 = vrot.slane %v188_v7, 1 }
 0x148   :  { %v194_v11 = vadd.f32 %v193_v9, %v192_v8  ;;  %v190_v13 = vadd.f32 %v189_v10, %v188_v7 }
 0x14a   :  { %v195_v12 = vrot.slane %v194_v11, 1 }
 0x14c   :  { %v196_v14 = vadd.f32 %v195_v12, %v194_v11 }
 0x14e   :  { %v200_v15 = vsel %vm199_vm2, %v196_v14, %v190_v13 }
 0x14f   :  { %202 = vst [vmem:[#allocation8] sm:$0x3] %v200_v15 }
 0x150   :  { %325 = shalt.err (!%p322_p5)
}
 0x151   :  { %212 = dma.vmem_to_hbm [thread:$0]  %s210_s7, 32, %s394_s4, [#allocation4]  }
 0x152   :  { %338 = dma.done.wait [#allocation4], 32  }
 0x153   :  { %339 = vsyncadd [#allocation4], 4294967264 }
 0x154   :  { %216 = vsyncpa [#allocation3], 1 }
 0x155   :  { %217 = vsyncpa [#allocation6], 1 }
 0x156   :  { %218 = vsyncpa [#allocation4], 1 }

</bundles_post_ra>
